<compile_context>
chip_gen: v7x
topology: tpu7x:2x2x1
jax: 0.10.0
libtpu: 0.0.40
codegen_flags: <defaults>
</compile_context>

<pallas_src>
import functools

import jax
import jax.numpy as jnp
from jax.experimental import pallas as pl
from jax.experimental.pallas import tpu as pltpu

CODEBOOK_WEIGHT = 1.0
PERCEPTUAL_WEIGHT = 0.0
DISC_WEIGHT = 0.8
DISC_FACTOR = 1.0
DISC_START = 25001

LRELU_SLOPE = 0.2
BN_EPS = 1e-5


def _round_up(x, m):
    return (x + m - 1) // m * m


# ----------------------- fused conv-layer Pallas kernels -----------------------

def _conv_bias_lrelu_kernel(a_ref, w_ref, b_ref, o_ref):
    # [Mp,Kp]bf16 @ [Kp,Np]bf16 -> f32 acc, + bias, LeakyReLU(0.2), store bf16
    y = jnp.dot(a_ref[...], w_ref[...], preferred_element_type=jnp.float32)
    y = y + b_ref[...]
    o_ref[...] = jnp.where(y > 0, y, LRELU_SLOPE * y).astype(o_ref.dtype)


def _conv_bn_lrelu_kernel(a_ref, w_ref, g_ref, b_ref, o_ref, *, m_valid):
    # matmul + train-mode BatchNorm over the m_valid real rows + LeakyReLU(0.2).
    # Padded rows of `a` are zero, so their matmul output is exactly 0; they are
    # masked out of the statistics and we divide by m_valid, not the padded count.
    y = jnp.dot(a_ref[...], w_ref[...], preferred_element_type=jnp.float32)
    mask = (jax.lax.broadcasted_iota(jnp.int32, y.shape, 0) < m_valid).astype(jnp.float32)
    inv_m = 1.0 / float(m_valid)
    mean = jnp.sum(y * mask, axis=0, keepdims=True) * inv_m
    var = jnp.sum(((y - mean) ** 2) * mask, axis=0, keepdims=True) * inv_m
    xhat = (y - mean) * jax.lax.rsqrt(var + BN_EPS)
    z = xhat * g_ref[...] + b_ref[...]
    o_ref[...] = jnp.where(z > 0, z, LRELU_SLOPE * z).astype(o_ref.dtype)


def _conv_final_matvec_kernel(a_ref, w_ref, b_ref, o_ref):
    # final conv has a single output channel: do it on the VPU (+ lane reduce on the
    # XLU) against the real [1, K] weight instead of padding K x 1 out to 128 MXU cols.
    x = a_ref[...].astype(jnp.float32)
    y = jnp.sum(x * w_ref[...], axis=-1, keepdims=True) + b_ref[...]
    o_ref[...] = y


def conv_matmul_fused(patches, layer):
    """patches: [M, K] bf16 im2col rows. Returns the valid [M, n_out] output.

    One pallas_call per layer: matmul (f32 accumulate) fused with its
    bias/BN/LeakyReLU epilogue.  Weights are pre-reshaped/padded/cast at init.
    """
    M, K = patches.shape
    Mp = _round_up(M, 8)

    if layer["kind"] == "final_bias":
        Kp = layer["w_row"].shape[1]
        a = patches if (Mp == M and Kp == K) else jnp.pad(patches, ((0, Mp - M), (0, Kp - K)))
        out = pl.pallas_call(
            _conv_final_matvec_kernel,
            out_shape=jax.ShapeDtypeStruct((Mp, 1), jnp.float32),
            grid=(1,),
            in_specs=[pl.BlockSpec((Mp, Kp), lambda i: (0, 0)),
                      pl.BlockSpec((1, Kp), lambda i: (0, 0)),
                      pl.BlockSpec((1, 1), lambda i: (0, 0))],
            out_specs=pl.BlockSpec((Mp, 1), lambda i: (0, 0)),
        )(a, layer["w_row"], layer["b_scalar"])
        return out[:M, :]

    w = layer["w_mat"]                       # [Kp, Np] bf16, pre-padded at init
    Kp, Np = w.shape
    a = patches if (Mp == M and Kp == K) else jnp.pad(patches, ((0, Mp - M), (0, Kp - K)))

    if layer["kind"] == "bias_lrelu":
        kernel = _conv_bias_lrelu_kernel
        extras = (layer["b_row"],)
    else:  # "bn_lrelu"
        kernel = functools.partial(_conv_bn_lrelu_kernel, m_valid=M)
        extras = (layer["gamma_row"], layer["beta_row"])

    # TODO(synk): at realistic VQ-GAN resolutions this single full-array block should be
    # tiled over M (and K with an 'arbitrary' accumulator axis) and sized for v7x's 64MiB VMEM.
    out = pl.pallas_call(
        kernel,
        out_shape=jax.ShapeDtypeStruct((Mp, Np), jnp.bfloat16),
        grid=(1,),
        in_specs=[pl.BlockSpec((Mp, Kp), lambda i: (0, 0)),
                  pl.BlockSpec((Kp, Np), lambda i: (0, 0))]
                 + [pl.BlockSpec((1, Np), lambda i: (0, 0)) for _ in extras],
        out_specs=pl.BlockSpec((Mp, Np), lambda i: (0, 0)),
    )(a, w, *extras)
    return out[:M, :layer["n_out"]]


# ------------------------------ loss reduction kernels ------------------------------

def _l1_sum_kernel(a_ref, b_ref, o_ref):
    o_ref[0, 0] = jnp.sum(jnp.abs(a_ref[...] - b_ref[...]))


def l1_mean_pallas(a, b):
    n = a.size
    npad = _round_up(n, 8 * 128)
    af = jnp.pad(a.reshape(-1).astype(jnp.float32), (0, npad - n)).reshape(-1, 128)
    bf = jnp.pad(b.reshape(-1).astype(jnp.float32), (0, npad - n)).reshape(-1, 128)
    s = pl.pallas_call(
        _l1_sum_kernel,
        out_shape=jax.ShapeDtypeStruct((1, 1), jnp.float32),
        grid=(1,),
        in_specs=[pl.BlockSpec(af.shape, lambda i: (0, 0)),
                  pl.BlockSpec(bf.shape, lambda i: (0, 0))],
        out_specs=pl.BlockSpec(memory_space=pltpu.MemorySpace.SMEM),
    )(af, bf)
    return s[0, 0] / n


def _softplus(z):
    return jnp.maximum(z, 0.0) + jnp.log(1.0 + jnp.exp(-jnp.abs(z)))


def _bce_ones_sum_kernel(x_ref, o_ref):
    # BCEWithLogits(x, target=1) per-element == softplus(-x)
    o_ref[0, 0] = jnp.sum(_softplus(-x_ref[...]))


def bce_with_logits_ones_mean_pallas(logits):
    n = logits.size
    npad = _round_up(n, 8 * 128)
    # lane-dense layout; pad with a huge positive logit so softplus(-pad) == 0.
    x = jnp.pad(logits.reshape(-1).astype(jnp.float32), (0, npad - n),
                constant_values=1e9).reshape(-1, 128)
    s = pl.pallas_call(
        _bce_ones_sum_kernel,
        out_shape=jax.ShapeDtypeStruct((1, 1), jnp.float32),
        grid=(1,),
        in_specs=[pl.BlockSpec(x.shape, lambda i: (0, 0))],
        out_specs=pl.BlockSpec(memory_space=pltpu.MemorySpace.SMEM),
    )(x)
    return s[0, 0] / n


def _hinge_sums_kernel(r_ref, f_ref, o_ref):
    o_ref[0, 0] = jnp.sum(jnp.maximum(1.0 - r_ref[...], 0.0))
    o_ref[0, 1] = jnp.sum(jnp.maximum(1.0 + f_ref[...], 0.0))


def hinge_d_loss_pallas(logits_real, logits_fake):
    nr, nf = logits_real.size, logits_fake.size

    def lane_dense(x, pad_val):
        n = x.size
        npad = _round_up(n, 8 * 128)
        return jnp.pad(x.reshape(-1).astype(jnp.float32), (0, npad - n),
                       constant_values=pad_val).reshape(-1, 128)

    r = lane_dense(logits_real, 1e9)    # relu(1 - 1e9)  == 0  -> pads contribute nothing
    f = lane_dense(logits_fake, -1e9)   # relu(1 + -1e9) == 0
    s = pl.pallas_call(
        _hinge_sums_kernel,
        out_shape=jax.ShapeDtypeStruct((1, 2), jnp.float32),
        grid=(1,),
        in_specs=[pl.BlockSpec(r.shape, lambda i: (0, 0)),
                  pl.BlockSpec(f.shape, lambda i: (0, 0))],
        out_specs=pl.BlockSpec(memory_space=pltpu.MemorySpace.SMEM),
    )(r, f)
    return 0.5 * (s[0, 0] / nr + s[0, 1] / nf)


# ----------------------- NLayerDiscriminator (PatchGAN) -----------------------

def init_discriminator_params(key, input_nc=1, ndf=64, n_layers=3):
    """weights_init semantics: conv W ~ N(0, 0.02), BN gamma ~ N(1, 0.02), BN beta = 0.

    Weights are reshaped to [K, N] matmul form, zero-padded to (128-multiple) and cast
    to bf16 ONCE here, so the steady-state forward does no per-step weight padding.
    """
    keys = list(jax.random.split(key, 16))
    ki = iter(keys)
    layers = []

    def pack_matmul(kind, stride, w, **extras):
        kh, kw, cin, cout = w.shape
        K, N = kh * kw * cin, cout
        Kp, Np = _round_up(K, 128), _round_up(N, 128)
        d = dict(kind=kind, stride=stride, n_out=N,
                 w_mat=jnp.pad(w.reshape(K, N), ((0, Kp - K), (0, Np - N))).astype(jnp.bfloat16))
        for name, v in extras.items():
            d[name] = jnp.pad(v.reshape(1, N).astype(jnp.float32), ((0, 0), (0, Np - N)))
        return d

    # first conv: bias=True, stride 2, LeakyReLU(0.2)
    w = 0.02 * jax.random.normal(next(ki), (4, 4, input_nc, ndf), jnp.float32)
    b = 0.02 * jax.random.normal(next(ki), (ndf,), jnp.float32)
    layers.append(pack_matmul("bias_lrelu", 2, w, b_row=b))

    nf_mult = 1
    for n in range(1, n_layers):
        nf_prev, nf_mult = nf_mult, min(2 ** n, 8)
        w = 0.02 * jax.random.normal(next(ki), (4, 4, ndf * nf_prev, ndf * nf_mult), jnp.float32)
        g = 1.0 + 0.02 * jax.random.normal(next(ki), (ndf * nf_mult,), jnp.float32)
        layers.append(pack_matmul("bn_lrelu", 2, w, gamma_row=g,
                                  beta_row=jnp.zeros((ndf * nf_mult,), jnp.float32)))

    nf_prev, nf_mult = nf_mult, min(2 ** n_layers, 8)
    w = 0.02 * jax.random.normal(next(ki), (4, 4, ndf * nf_prev, ndf * nf_mult), jnp.float32)
    g = 1.0 + 0.02 * jax.random.normal(next(ki), (ndf * nf_mult,), jnp.float32)
    layers.append(pack_matmul("bn_lrelu", 1, w, gamma_row=g,
                              beta_row=jnp.zeros((ndf * nf_mult,), jnp.float32)))

    # final conv: bias=True, stride 1, 1 output channel, no activation -> matvec layer
    w = 0.02 * jax.random.normal(next(ki), (4, 4, ndf * nf_mult, 1), jnp.float32)
    b = 0.02 * jax.random.normal(next(ki), (1,), jnp.float32)
    K = 4 * 4 * ndf * nf_mult
    Kp = _round_up(K, 128)
    layers.append(dict(kind="final_bias", stride=1, n_out=1,
                       w_row=jnp.pad(w.reshape(K, 1).T, ((0, 0), (0, Kp - K))).astype(jnp.float32),
                       b_scalar=b.reshape(1, 1).astype(jnp.float32)))
    return layers


def im2col(x, kh, kw, stride, pad):
    """x: [N, H, W, C] -> ([N*oh*ow, kh*kw*C], (N, oh, ow))."""
    # TODO(synk): this patch gather is still XLA glue (16 strided slices + stack); a fully
    # fused in-kernel gather (phase-split + contiguous in-kernel slices) would remove it.
    x = jnp.pad(x, ((0, 0), (pad, pad), (pad, pad), (0, 0)))
    N, H, W, C = x.shape
    oh = (H - kh) // stride + 1
    ow = (W - kw) // stride + 1
    cols = []
    for i in range(kh):
        for j in range(kw):
            cols.append(x[:, i:i + stride * oh:stride, j:j + stride * ow:stride, :])
    p = jnp.stack(cols, axis=3)  # [N, oh, ow, kh*kw, C]
    return p.reshape(N * oh * ow, kh * kw * C), (N, oh, ow)


def discriminator_forward(params, x_nhwc):
    h = x_nhwc.astype(jnp.bfloat16)          # bf16 activations through the MXU
    for layer in params:
        patches, (N, oh, ow) = im2col(h, 4, 4, layer["stride"], 1)
        y = conv_matmul_fused(patches, layer)         # one fused pallas_call per layer
        h = y.reshape(N, oh, ow, layer["n_out"])
    return h.astype(jnp.float32)              # logits, NHWC, f32 (final layer already f32)


# ----------------------------------- VQLossDisc -----------------------------------

def adopt_weight(weight, global_step, threshold=0, value=0.0):
    if isinstance(global_step, (int, float)):
        return value if global_step < threshold else weight
    return jnp.where(global_step < threshold, value, weight)


def vqloss_forward(params, codebook_loss, reconstructions, inputs,
                   optimizer_idx=0, global_step=0, last_layer=None):
    """inputs/reconstructions: NCHW float32 (PyTorch convention)."""
    inputs_nhwc = jnp.transpose(inputs, (0, 2, 3, 1))
    recon_nhwc = jnp.transpose(reconstructions, (0, 2, 3, 1))

    disc_factor = adopt_weight(DISC_FACTOR, global_step, threshold=DISC_START)

    if optimizer_idx == 0:
        # ---------------- ae_loss ----------------
        nll_loss = l1_mean_pallas(inputs, reconstructions)   # mean |x - x_hat|
        l1_copy = nll_loss
        p_loss = jnp.float32(0.0)                            # perceptual_weight == 0
        # g_loss is still computed (it is part of the returned log, as in the PyTorch
        # module) even though it contributes with weight 0 here.
        logits_fake = discriminator_forward(params, recon_nhwc)
        g_loss = bce_with_logits_ones_mean_pallas(logits_fake)
        # TODO(synk): adaptive d_weight needs autograd grads of nll/g losses w.r.t. an
        # external decoder `last_layer`; with last_layer=None the PyTorch eval fallback
        # gives d_weight = 0, reproduced here.
        d_weight = jnp.float32(0.0)
        loss = (nll_loss
                + CODEBOOK_WEIGHT * jnp.mean(codebook_loss)
                + d_weight * disc_factor * g_loss)
        return {"loss": loss,
                "l1": l1_copy,
                "codebook": codebook_loss,
                "p": jnp.abs(jnp.mean(p_loss)) * 10,
                "disc_factor": jnp.asarray(disc_factor, jnp.float32),
                "d_weight": d_weight,
                "g_loss": g_loss}
    else:
        # ---------------- disc_loss ----------------
        # Two separate passes (not one concatenated pass) so train-mode BatchNorm
        # statistics match PyTorch's two independent forward calls.
        logits_real = discriminator_forward(params, inputs_nhwc)
        logits_fake = discriminator_forward(params, recon_nhwc)
        d_loss = hinge_d_loss_pallas(logits_real, logits_fake)
        d_loss_copy = d_loss
        d_loss = disc_factor * d_loss
        log = {"disc_loss": d_loss_copy,
               "logits_real": jnp.mean(logits_real),
               "logits_fake": jnp.mean(logits_fake)}
        return d_loss, log


if __name__ == "__main__":
    key = jax.random.PRNGKey(0)
    k1, k2, k3 = jax.random.split(key, 3)
    # Spatial size 32 so the 5-layer PatchGAN (3x stride-2 + 2x stride-1, k=4, p=1)
    # produces a valid 2x2 logit map.
    inputs = jax.random.normal(k1, (2, 1, 32, 32), jnp.float32)
    reconstructions = inputs + 0.1 * jax.random.normal(k2, (2, 1, 32, 32), jnp.float32)
    codebook_loss = 0.01 * jnp.abs(jax.random.normal(k3, (2,), jnp.float32))

    disc_params = init_discriminator_params(jax.random.PRNGKey(1))

    # optimizer_idx == 0 : autoencoder / generator loss
    ae_out = vqloss_forward(disc_params, codebook_loss, reconstructions, inputs,
                            optimizer_idx=0, global_step=0, last_layer=None)
    # optimizer_idx == 1 : discriminator loss
    d_loss, d_log = vqloss_forward(disc_params, codebook_loss, reconstructions, inputs,
                                   optimizer_idx=1, global_step=0)

    jax.block_until_ready((ae_out, d_loss, d_log))
    print("KERNEL_OK")
</pallas_src>

<mosaic_0001>
module attributes {stable_mosaic.version = 11 : i64} {
  func.func @_l1_sum_kernel(%arg0: i32, %arg1: memref<16x128xf32, #tpu.memory_space<vmem>>, %arg2: memref<16x128xf32, #tpu.memory_space<vmem>>, %arg3: memref<1x1xf32, #tpu.memory_space<smem>>) attributes {dimension_semantics = [#tpu.dimension_semantics<arbitrary>], iteration_bounds = array<i64: 1>, scalar_prefetch = 0 : i64, scratch_operands = 0 : i64, tpu.core_type = #tpu.core_type<tc>, window_params = [{pipeline_mode = #tpu.pipeline_mode<synchronous>, transform_indices = @transform_0, window_bounds = array<i64: 16, 128>}, {pipeline_mode = #tpu.pipeline_mode<synchronous>, transform_indices = @transform_1, window_bounds = array<i64: 16, 128>}, {transform_indices = @transform_2, window_bounds = array<i64: 1, 1>}]} {
    %c0 = arith.constant 0 : index
    %c0_0 = arith.constant 0 : index
    %0 = vector.load %arg1[%c0, %c0_0] : memref<16x128xf32, #tpu.memory_space<vmem>>, vector<16x128xf32>
    %c0_1 = arith.constant 0 : index
    %c0_2 = arith.constant 0 : index
    %1 = vector.load %arg2[%c0_1, %c0_2] : memref<16x128xf32, #tpu.memory_space<vmem>>, vector<16x128xf32>
    %2 = arith.subf %0, %1 : vector<16x128xf32>
    %3 = math.absf %2 : vector<16x128xf32>
    %4 = vector.shape_cast %3 : vector<16x128xf32> to vector<1x16x128xf32>
    %cst = arith.constant dense<0.000000e+00> : vector<1xf32>
    %5 = vector.multi_reduction <add>, %4, %cst [1, 2] : vector<1x16x128xf32> to vector<1xf32>
    %6 = vector.shape_cast %5 : vector<1xf32> to vector<1x1x1xf32>
    %7 = vector.extract %6[0, 0, 0] : f32 from vector<1x1x1xf32>
    %c0_3 = arith.constant 0 : index
    %c0_4 = arith.constant 0 : index
    %8 = memref.load %arg3[%c0_3, %c0_4] : memref<1x1xf32, #tpu.memory_space<smem>>
    memref.store %7, %arg3[%c0_3, %c0_4] : memref<1x1xf32, #tpu.memory_space<smem>>
    return
  }
  func.func @transform_0(%arg0: i32) -> (i32, i32) {
    %c0_i32 = arith.constant 0 : i32
    %c0_i32_0 = arith.constant 0 : i32
    %c0_i32_1 = arith.constant 0 : i32
    return %c0_i32, %c0_i32_0 : i32, i32
  }
  func.func @transform_1(%arg0: i32) -> (i32, i32) {
    %c0_i32 = arith.constant 0 : i32
    %c0_i32_0 = arith.constant 0 : i32
    %c0_i32_1 = arith.constant 0 : i32
    return %c0_i32, %c0_i32_0 : i32, i32
  }
  func.func @transform_2(%arg0: i32) -> (i32, i32) {
    %c0_i32 = arith.constant 0 : i32
    %c0_i32_0 = arith.constant 0 : i32
    %c0_i32_1 = arith.constant 0 : i32
    return %c0_i32, %c0_i32_0 : i32, i32
  }
}

</mosaic_0001>

<bundles_post_ra>
// kernel: tpu_custom_call.1
= control target key start
LH: loop header
LB: loop body
LE: loop exit
PB: predicated region body
PF: predicated region fallthrough
CT: control target
= control target key end

     0   :  { %7 = vsyncpa [#allocation3], 0  ;;  %s198_s0 = inlined_call_operand.hbm [shape: f32[16,128], index: 0, kind: input, shape index: {}]   ;;  %s199_s1 = inlined_call_operand.hbm [shape: f32[16,128], index: 1, kind: input, shape index: {}]   ;;  %s200_s2 = inlined_call_operand.hbm [shape: f32[1,1], index: 2, kind: output, shape index: {}]  }
   0x1   :  { %8 = vsyncpa [#allocation6], 0 }
   0x2   :  { %9 = vsyncpa [#allocation4], 0  ;;  %s142_s9 = smov [#allocation2]   ;;  %s82_s13 = scalar_lea.hbm %s198_s0, 256 }
   0x3   :  { %s15_s10 = sshll.u32 %s142_s9, 4  ;;  %p83_p0 = scmp.ne.s32.totalorder %s198_s0, %s82_s13  ;;  %s16_s10 = int_to_ptr.vmem [resolvable:$true] %s15_s10 }
   0x4   :  { %p86_p1 = scmp.lt.u32.totalorder %s82_s13, %s198_s0 }
   0x6   :  { %p88_p2 = pnand %p86_p1, %p83_p0 }
   0x8   :  { %91 = shalt.err (!%p88_p2)
}
   0x9   :  { %s92_s18 = scalar_lea.vmem %s16_s10, 256  ;;  %p97_p4 = scmp.lt.s32.totalorder %s16_s10, %s16_s10 }
   0xa   :  { %p93_p3 = scmp.ne.s32.totalorder %s16_s10, %s92_s18  ;;  %p98_p5 = scmp.lt.s32.totalorder %s92_s18, %s92_s18 }
   0xc   :  { %p99_p6 = por %p98_p5, %p97_p4 }
   0xe   :  { %p100_p7 = pnand %p99_p6, %p93_p3 }
  0x10   :  { %103 = shalt.err (!%p100_p7)
}
  0x11   :  { %s143_s19 = smov 128   ;;  %s144_s20 = smov 8  }
  0x12   :  { %21 = dma.hbm_to_vmem [thread:$0]  %s198_s0, 256, %s16_s10, [#allocation3], %s143_s19, %s143_s19, %s144_s20  }
  0x13   :  { %s145_s23 = smov [#allocation5]   ;;  %s104_s27 = scalar_lea.hbm %s199_s1, 256 }
  0x14   :  { %s27_s24 = sshll.u32 %s145_s23, 4  ;;  %p105_p8 = scmp.ne.s32.totalorder %s199_s1, %s104_s27  ;;  %s28_s24 = int_to_ptr.vmem [resolvable:$true] %s27_s24 }
  0x15   :  { %p108_p9 = scmp.lt.u32.totalorder %s104_s27, %s199_s1 }
  0x17   :  { %p110_p10 = pnand %p108_p9, %p105_p8 }
  0x19   :  { %113 = shalt.err (!%p110_p10)
}
  0x1a   :  { %s114_s4 = scalar_lea.vmem %s28_s24, 256  ;;  %p119_p12 = scmp.lt.s32.totalorder %s28_s24, %s28_s24 }
  0x1b   :  { %p115_p11 = scmp.ne.s32.totalorder %s28_s24, %s114_s4  ;;  %p120_p13 = scmp.lt.s32.totalorder %s114_s4, %s114_s4 }
  0x1d   :  { %p121_p0 = por %p120_p13, %p119_p12 }
  0x1f   :  { %p122_p1 = pnand %p121_p0, %p115_p11 }
  0x21   :  { %125 = shalt.err (!%p122_p1)
}
  0x22   :  { %33 = dma.hbm_to_vmem [thread:$0]  %s199_s1, 256, %s28_s24, [#allocation6], %s143_s19, %s143_s19, %s144_s20  }
  0x23   :  { %136 = dma.done.wait [#allocation3], 256  }
  0x24   :  { %137 = vsyncadd [#allocation3], 4294967040 }
  0x25   :  { %138 = dma.done.wait [#allocation6], 256  }
  0x26   :  { %139 = vsyncadd [#allocation6], 4294967040  ;;  %v40_v0 = vld [vmem:[#allocation2] sm:$0xff]  ;;  %v41_v1 = vld [vmem:[#allocation2 + $0x8] sm:$0xff]  ;;  %s126_s8 = scalar_lea.hbm %s200_s2, 16 }
  0x27   :  { %v42_v2 = vld [vmem:[#allocation5] sm:$0xff]  ;;  %v43_v3 = vld [vmem:[#allocation5 + $0x8] sm:$0xff]  ;;  %p127_p2 = scmp.ne.s32.totalorder %s200_s2, %s126_s8  ;;  %p130_p3 = scmp.lt.u32.totalorder %s126_s8, %s200_s2 }
  0x28   :  { %v44_v4 = vsub.f32 %v40_v0, %v42_v2  ;;  %v45_v5 = vsub.f32 %v41_v1, %v43_v3 }
  0x29   :  { %p132_p4 = pnand %p130_p3, %p127_p2 }
  0x2a   :  { %v46_v6 = vand.u32 2147483647, %v44_v4  ;;  %v47_v7 = vand.u32 2147483647, %v45_v5 }
  0x2c   :  { %v48_v8 = vadd.f32 %v47_v7, %v46_v6 }
  0x2e   :  { %49 = vadd.xlane.f32.xlu0 %v48_v8 }
  0xbb   :  { %v50_v9 = vpop.xlane.xlu0 %49 }
  0xbc   :  { %v51_v10 = vrot.slane %v50_v9, 4 }
  0xbe   :  { %v52_v11 = vadd.f32 %v51_v10, %v50_v9 }
  0xc0   :  { %v53_v12 = vrot.slane %v52_v11, 2 }
  0xc2   :  { %v54_v13 = vadd.f32 %v53_v12, %v52_v11 }
  0xc4   :  { %v55_v14 = vrot.slane %v54_v13, 1 }
  0xc6   :  { %v56_v15 = vadd.f32 %v55_v14, %v54_v13 }
  0xc8   :  { %75 = vpush %v56_v15 }
  0xf9   :  { %s76_s1 = spop %75 }
  0xfa   :  { %59 = sst [smem:[#allocation7]] %s76_s1 }
  0xfb   :  { %135 = shalt.err (!%p132_p4)
}
  0xfc   :  { %s146_s13 = smov [#allocation7]  }
  0xfd   :  { %67 = dma.smem_to_hbm %s146_s13, 16, %s200_s2, [#allocation4]  }
  0xfe   :  { %140 = dma.done.wait [#allocation4], 16  }
  0xff   :  { %141 = vsyncadd [#allocation4], 4294967280 }
 0x100   :  { %71 = sfence }
 0x101   :  { %72 = vsyncpa [#allocation3], 1 }
 0x102   :  { %73 = vsyncpa [#allocation6], 1 }
 0x103   :  { %74 = vsyncpa [#allocation4], 1 }

</bundles_post_ra>
